<compile_context>
chip_gen: v7x
topology: tpu7x:2x2x1
jax: 0.10.0
libtpu: 0.0.40
codegen_flags: <defaults>
</compile_context>

<pallas_src>
import jax
import jax.numpy as jnp
from jax.experimental import pallas as pl
from jax.experimental.pallas import tpu as pltpu


def _round_up(x, m):
    return (x + m - 1) // m * m


def _make_kernel(num_classes: int, lanes: int):
    """Builds the per-tile partial-reduction kernel.

    pred_ref : (TILE_R, LANES) float   lane-packed log-probs
    tgt_ref  : (TILE_R, LANES) int32   per-element target class id (packed path)
               or (TILE_R, 1) int32    one label per row (C >= 128 path)
    out_ref  : (1, 3, LANES) f32 resident accumulator per shard:
               row 0: sum_n exp(pred) per lane
               row 1: class counts    per lane
               row 2: sum of selected target log-probs per lane
    """

    def kernel(pred_ref, tgt_ref, out_ref):
        j = pl.program_id(1)

        @pl.when(j == 0)
        def _zero():
            out_ref[...] = jnp.zeros_like(out_ref)

        pred = pred_ref[...].astype(jnp.float32)          # (tile_r, lanes)
        tgt = tgt_ref[...]                                # int32
        tile_r = pred.shape[0]

        # class id of each lane (lane index modulo num_classes)
        class_ids = jax.lax.broadcasted_iota(jnp.int32, pred.shape, 1)
        if lanes != num_classes:
            class_ids = class_ids % num_classes

        eq = class_ids == tgt                             # broadcasts if tgt is (tile_r, 1)
        eq_f = eq.astype(jnp.float32)
        probs = jnp.exp(pred)                             # EUP
        masked_pred = jnp.where(eq, pred, 0.0)            # avoids 0 * (-inf) = NaN

        # Column (axis-0) reductions on the otherwise-idle MXU.
        ones_row = jnp.ones((1, tile_r), jnp.float32)
        col_probs = jnp.dot(ones_row, probs, preferred_element_type=jnp.float32)
        col_counts = jnp.dot(ones_row, eq_f, preferred_element_type=jnp.float32)
        col_nll = jnp.dot(ones_row, masked_pred, preferred_element_type=jnp.float32)

        update = jnp.concatenate([col_probs, col_counts, col_nll], axis=0)   # (3, lanes)
        out_ref[...] += update[jnp.newaxis]

    return kernel


def new_loss_fn_pallas(predictions, targets, *, tile_rows_max=1024):
    """predictions: (N, C) log-probs (f32 or bf16); targets: (N,) int labels."""
    n, c = predictions.shape
    if predictions.dtype not in (jnp.float32, jnp.bfloat16):
        predictions = predictions.astype(jnp.float32)     # bf16 stays bf16 (v6e/v7x)
    targets = targets.astype(jnp.int32)
    itemsize = predictions.dtype.itemsize

    # --- lane-dense packing: fold k batch rows into the 128-lane axis when C is small.
    k = max(1, 128 // c)
    lanes = k * c
    lanes_pad = _round_up(lanes, 128)

    # --- tile size: largest row tile whose prediction buffer stays ~<= 4 MiB
    #     (keeps 2x double-buffered inputs well inside scoped VMEM on v5e/v6e/v7x).
    budget = 4 * 1024 * 1024
    cap = max(8, (budget // (lanes_pad * 4)) // 8 * 8)
    rows_needed = -(-n // k)
    tile_r = min(tile_rows_max, cap, _round_up(rows_needed, 8))

    n_tiles = -(-rows_needed // tile_r)
    num_shards = 2 if n_tiles >= 2 else 1                 # v7x: split over both TCs
    tiles_per_shard = -(-n_tiles // num_shards)
    rows_pad = num_shards * tiles_per_shard * tile_r
    n_pad = rows_pad * k

    # --- padding rows contribute exactly zero: exp(-1e9) == 0, label -1 never matches.
    pred_pad = jnp.pad(predictions, ((0, n_pad - n), (0, 0)), constant_values=-1e9)
    tgt_pad = jnp.pad(targets, (0, n_pad - n), constant_values=-1)

    pred_arr = pred_pad.reshape(rows_pad, lanes)
    if k > 1:
        # per-element class label, laid out to match the lane packing of pred_arr
        tgt_arr = jnp.repeat(tgt_pad, c).reshape(rows_pad, lanes)
        tgt_block = (tile_r, lanes)
        tgt_lane_bytes = lanes_pad * 4
    else:
        tgt_arr = tgt_pad.reshape(rows_pad, 1)
        tgt_block = (tile_r, 1)
        tgt_lane_bytes = 128 * 4

    idx = lambda s, j: (s * tiles_per_shard + j, 0)

    vmem_limit = int(
        2 * tile_r * (lanes_pad * itemsize + tgt_lane_bytes)   # double-buffered inputs
        + 2 * 8 * lanes_pad * 4                                # resident output blocks
        + (4 << 20))                                           # headroom / internal scratch

    partial = pl.pallas_call(
        _make_kernel(c, lanes),
        out_shape=jax.ShapeDtypeStruct((num_shards, 3, lanes), jnp.float32),
        grid=(num_shards, tiles_per_shard),
        in_specs=[
            pl.BlockSpec((tile_r, lanes), idx),
            pl.BlockSpec(tgt_block, idx),
        ],
        out_specs=pl.BlockSpec((1, 3, lanes), lambda s, j: (s, 0, 0)),
        compiler_params=pltpu.CompilerParams(
            dimension_semantics=("parallel", "arbitrary"),
            vmem_limit_bytes=vmem_limit,
        ),
    )(pred_arr, tgt_arr)

    # --- tiny epilogue (runs once): combine shards, unfold lane packing, finalize.
    per_lane = jnp.sum(partial, axis=0)                    # (3, lanes)
    per_class = per_lane.reshape(3, k, c).sum(axis=1)      # (3, C)
    col_probs, col_counts, col_nll = per_class[0], per_class[1], per_class[2]
    n_f = jnp.float32(n)
    nll = -jnp.sum(col_nll) / n_f
    penalty = jnp.sum(jnp.abs((col_counts - col_probs) / n_f))
    return nll + penalty


def _reference(predictions, targets, num_classes):
    # pure-JAX reference mirroring the PyTorch forward
    n = predictions.shape[0]
    predictions = predictions.astype(jnp.float32)
    probs = jnp.exp(predictions)
    counts = jnp.sum(
        jax.nn.one_hot(targets, num_classes, dtype=jnp.float32), axis=0)
    penalty = jnp.sum(jnp.abs((counts - jnp.sum(probs, axis=0)) / n))
    nll = -jnp.mean(predictions[jnp.arange(n), targets])
    return nll + penalty


if __name__ == "__main__":
    N, C = 8, 4  # batch, num_classes
    key = jax.random.PRNGKey(0)
    k1, k2 = jax.random.split(key)
    logits = jax.random.normal(k1, (N, C), dtype=jnp.float32)
    predictions = jax.nn.log_softmax(logits, axis=-1)   # log-probs, like the module expects
    targets = jax.random.randint(k2, (N,), 0, C, dtype=jnp.int32)

    loss = new_loss_fn_pallas(predictions, targets)
    jax.block_until_ready(loss)

    ref = _reference(predictions, targets, C)
    assert jnp.allclose(loss, ref, atol=1e-5, rtol=1e-5), (loss, ref)
    print("KERNEL_OK")
</pallas_src>

<mosaic_0001>
module attributes {stable_mosaic.version = 11 : i64} {
  func.func @kernel(%arg0: i32, %arg1: i32, %arg2: memref<8x128xf32, #tpu.memory_space<vmem>>, %arg3: memref<8x128xi32, #tpu.memory_space<vmem>>, %arg4: memref<1x3x128xf32, #tpu.memory_space<vmem>>) attributes {dimension_semantics = [#tpu.dimension_semantics<parallel>, #tpu.dimension_semantics<arbitrary>], iteration_bounds = array<i64: 1, 1>, scalar_prefetch = 0 : i64, scratch_operands = 0 : i64, tpu.core_type = #tpu.core_type<tc>, window_params = [{transform_indices = @transform_0, window_bounds = array<i64: 8, 128>}, {transform_indices = @transform_1, window_bounds = array<i64: 8, 128>}, {transform_indices = @transform_2, window_bounds = array<i64: 1, 3, 128>}]} {
    %c0_i32 = arith.constant 0 : i32
    %0 = arith.cmpi eq, %arg1, %c0_i32 : i32
    %1 = arith.extui %0 : i1 to i32
    %c0_i32_0 = arith.constant 0 : i32
    %2 = arith.cmpi ne, %1, %c0_i32_0 : i32
    scf.if %2 {
      %cst_18 = arith.constant 0.000000e+00 : f32
      %37 = vector.broadcast %cst_18 : f32 to vector<1x3x128xf32>
      %c0_19 = arith.constant 0 : index
      %c0_20 = arith.constant 0 : index
      %c0_21 = arith.constant 0 : index
      %38 = vector.load %arg4[%c0_19, %c0_20, %c0_21] : memref<1x3x128xf32, #tpu.memory_space<vmem>>, vector<1x3x128xf32>
      tpu.vector_store %arg4[%c0_19, %c0_20, %c0_21], %37 {strides = array<i32>} : memref<1x3x128xf32, #tpu.memory_space<vmem>>, vector<1x3x128xf32>,
    } else {
    }
    %c0 = arith.constant 0 : index
    %c0_1 = arith.constant 0 : index
    %3 = vector.load %arg2[%c0, %c0_1] : memref<8x128xf32, #tpu.memory_space<vmem>>, vector<8x128xf32>
    %c0_2 = arith.constant 0 : index
    %c0_3 = arith.constant 0 : index
    %4 = vector.load %arg3[%c0_2, %c0_3] : memref<8x128xi32, #tpu.memory_space<vmem>>, vector<8x128xi32>
    %5 = tpu.iota {dimensions = array<i32: 1>} : vector<8x128xi32>
    %c4_i32 = arith.constant 4 : i32
    %c0_i32_4 = arith.constant 0 : i32
    %6 = arith.cmpi eq, %c4_i32, %c0_i32_4 : i32
    %c1_i32 = arith.constant 1 : i32
    %7 = arith.select %6, %c1_i32, %c4_i32 : i32
    %8 = vector.broadcast %7 : i32 to vector<8x128xi32>
    %9 = arith.remsi %5, %8 : vector<8x128xi32>
    %c0_i32_5 = arith.constant 0 : i32
    %10 = vector.broadcast %c0_i32_5 : i32 to vector<8x128xi32>
    %11 = arith.cmpi ne, %9, %10 : vector<8x128xi32>
    %c0_i32_6 = arith.constant 0 : i32
    %12 = vector.broadcast %c0_i32_6 : i32 to vector<8x128xi32>
    %13 = arith.cmpi slt, %9, %12 : vector<8x128xi32>
    %c0_i32_7 = arith.constant 0 : i32
    %14 = arith.cmpi slt, %7, %c0_i32_7 : i32
    %15 = vector.broadcast %14 : i1 to vector<8x128xi1>
    %16 = vector.broadcast %15 : vector<8x128xi1> to vector<8x128xi1>
    %17 = arith.xori %13, %16 : vector<8x128xi1>
    %18 = arith.andi %17, %11 : vector<8x128xi1>
    %19 = vector.broadcast %7 : i32 to vector<8x128xi32>
    %20 = arith.addi %9, %19 : vector<8x128xi32>
    %21 = arith.select %18, %20, %9 : vector<8x128xi1>, vector<8x128xi32>
    %22 = arith.cmpi eq, %21, %4 : vector<8x128xi32>
    %23 = arith.extui %22 : vector<8x128xi1> to vector<8x128xi32>
    %24 = arith.sitofp %23 : vector<8x128xi32> to vector<8x128xf32>
    %25 = math.exp %3 : vector<8x128xf32>
    %cst = arith.constant 0.000000e+00 : f32
    %26 = vector.broadcast %cst : f32 to vector<8x128xf32>
    %27 = arith.select %22, %3, %26 : vector<8x128xi1>, vector<8x128xf32>
    %cst_8 = arith.constant 1.000000e+00 : f32
    %28 = vector.broadcast %cst_8 : f32 to vector<1x8xf32>
    %cst_9 = arith.constant dense<0.000000e+00> : vector<1x128xf32>
    %29 = tpu.matmul %28, %25, %cst_9 {dimension_numbers = #tpu.dot_dimension_numbers<[1], [0], [0], [1], [0, 0, 1, 1], [], []>} : vector<1x8xf32>, vector<8x128xf32>, vector<1x128xf32> -> vector<1x128xf32>
    %cst_10 = arith.constant dense<0.000000e+00> : vector<1x128xf32>
    %30 = tpu.matmul %28, %24, %cst_10 {dimension_numbers = #tpu.dot_dimension_numbers<[1], [0], [0], [1], [0, 0, 1, 1], [], []>} : vector<1x8xf32>, vector<8x128xf32>, vector<1x128xf32> -> vector<1x128xf32>
    %cst_11 = arith.constant dense<0.000000e+00> : vector<1x128xf32>
    %31 = tpu.matmul %28, %27, %cst_11 {dimension_numbers = #tpu.dot_dimension_numbers<[1], [0], [0], [1], [0, 0, 1, 1], [], []>} : vector<1x8xf32>, vector<8x128xf32>, vector<1x128xf32> -> vector<1x128xf32>
    %32 = tpu.concatenate %29, %30, %31 in 0 : vector<1x128xf32>, vector<1x128xf32>, vector<1x128xf32> -> vector<3x128xf32>
    %c0_12 = arith.constant 0 : index
    %c0_13 = arith.constant 0 : index
    %c0_14 = arith.constant 0 : index
    %33 = vector.load %arg4[%c0_12, %c0_13, %c0_14] : memref<1x3x128xf32, #tpu.memory_space<vmem>>, vector<1x3x128xf32>
    %34 = vector.shape_cast %32 : vector<3x128xf32> to vector<1x3x128xf32>
    %35 = arith.addf %33, %34 : vector<1x3x128xf32>
    %c0_15 = arith.constant 0 : index
    %c0_16 = arith.constant 0 : index
    %c0_17 = arith.constant 0 : index
    %36 = vector.load %arg4[%c0_15, %c0_16, %c0_17] : memref<1x3x128xf32, #tpu.memory_space<vmem>>, vector<1x3x128xf32>
    tpu.vector_store %arg4[%c0_15, %c0_16, %c0_17], %35 {strides = array<i32>} : memref<1x3x128xf32, #tpu.memory_space<vmem>>, vector<1x3x128xf32>,
    return
  }
  func.func @transform_0(%arg0: i32, %arg1: i32) -> (i32, i32) {
    %c1_i32 = arith.constant 1 : i32
    %0 = arith.muli %arg0, %c1_i32 : i32
    %1 = arith.addi %0, %arg1 : i32
    %c0_i32 = arith.constant 0 : i32
    %c0_i32_0 = arith.constant 0 : i32
    return %1, %c0_i32 : i32, i32
  }
  func.func @transform_1(%arg0: i32, %arg1: i32) -> (i32, i32) {
    %c1_i32 = arith.constant 1 : i32
    %0 = arith.muli %arg0, %c1_i32 : i32
    %1 = arith.addi %0, %arg1 : i32
    %c0_i32 = arith.constant 0 : i32
    %c0_i32_0 = arith.constant 0 : i32
    return %1, %c0_i32 : i32, i32
  }
  func.func @transform_2(%arg0: i32, %arg1: i32) -> (i32, i32, i32) {
    %c0_i32 = arith.constant 0 : i32
    %c0_i32_0 = arith.constant 0 : i32
    %c0_i32_1 = arith.constant 0 : i32
    return %arg0, %c0_i32, %c0_i32_0 : i32, i32, i32
  }
}

</mosaic_0001>

<bundles_post_ra>
// kernel: tpu_custom_call.1
= control target key start
LH: loop header
LB: loop body
LE: loop exit
PB: predicated region body
PF: predicated region fallthrough
CT: control target
= control target key end

     0   :  { %7 = vsyncpa [#allocation3], 0  ;;  %s441_s0 = inlined_call_operand.hbm [shape: f32[8,128], index: 0, kind: input, shape index: {}]   ;;  %s442_s1 = inlined_call_operand.hbm [shape: s32[8,128], index: 1, kind: input, shape index: {}]   ;;  %s443_s2 = inlined_call_operand.vmem [shape: f32[1,3,128], index: 2, kind: output, shape index: {}]  }
   0x1   :  { %8 = vsyncpa [#allocation5], 0  ;;  %s385_s9 = smov [#allocation2]   ;;  %s386_s11 = smov [#allocation4]  }
   0x2   :  { %s18_s10 = sshll.u32 %s385_s9, 4  ;;  %s31_s12 = sshll.u32 %s386_s11, 4  ;;  %s19_s10 = int_to_ptr.vmem [resolvable:$true] %s18_s10  ;;  %s32_s12 = int_to_ptr.vmem [resolvable:$true] %s31_s12 }
   0x3   :  { %s337_s15 = scalar_lea.hbm %s441_s0, 128 }
   0x4   :  { %p338_p0 = scmp.ne.s32.totalorder %s441_s0, %s337_s15  ;;  %p341_p1 = scmp.lt.u32.totalorder %s337_s15, %s441_s0 }
   0x6   :  { %p343_p2 = pnand %p341_p1, %p338_p0 }
   0x8   :  { %346 = shalt.err (!%p343_p2)
}
   0x9   :  { %s347_s20 = scalar_lea.vmem %s19_s10, 128  ;;  %p352_p4 = scmp.lt.s32.totalorder %s19_s10, %s19_s10 }
   0xa   :  { %p348_p3 = scmp.ne.s32.totalorder %s19_s10, %s347_s20  ;;  %p353_p5 = scmp.lt.s32.totalorder %s347_s20, %s347_s20 }
   0xc   :  { %p354_p6 = por %p353_p5, %p352_p4 }
   0xe   :  { %p355_p7 = pnand %p354_p6, %p348_p3 }
  0x10   :  { %358 = shalt.err (!%p355_p7)
}
  0x11   :  { %21 = dma.hbm_to_vmem [thread:$0]  %s441_s0, 128, %s19_s10, [#allocation3]  }
  0x12   :  { %s359_s25 = scalar_lea.hbm %s442_s1, 128 }
  0x13   :  { %p360_p8 = scmp.ne.s32.totalorder %s442_s1, %s359_s25  ;;  %p363_p9 = scmp.lt.u32.totalorder %s359_s25, %s442_s1 }
  0x15   :  { %p365_p10 = pnand %p363_p9, %p360_p8 }
  0x17   :  { %368 = shalt.err (!%p365_p10)
}
  0x18   :  { %s369_s30 = scalar_lea.vmem %s32_s12, 128  ;;  %p374_p12 = scmp.lt.s32.totalorder %s32_s12, %s32_s12 }
  0x19   :  { %p370_p11 = scmp.ne.s32.totalorder %s32_s12, %s369_s30  ;;  %p375_p13 = scmp.lt.s32.totalorder %s369_s30, %s369_s30 }
  0x1b   :  { %p376_p0 = por %p375_p13, %p374_p12 }
  0x1d   :  { %p377_p1 = pnand %p376_p0, %p370_p11 }
  0x1f   :  { %380 = shalt.err (!%p377_p1)
}
  0x20   :  { %34 = dma.hbm_to_vmem [thread:$0]  %s442_s1, 128, %s32_s12, [#allocation5]  }
  0x21   :  { %381 = dma.done.wait [#allocation3], 128  }
  0x22   :  { %382 = vsyncadd [#allocation3], 4294967168 }
  0x23   :  { %383 = dma.done.wait [#allocation5], 128  }
  0x24   :  { %384 = vsyncadd [#allocation5], 4294967168  ;;  %v50_v0 = vlaneseq  ;;  %v387_v1 = vmov 0.0   ;;  %vm388_vm0 = vmmov 0   ;;  %v49_v4 = vld [vmem:[#allocation4] sm:$0xff]  ;;  %v48_v5 = vld [vmem:[#allocation2] sm:$0xff] }
  0x25   :  { %47 = vst [vmem:[%s443_s2] sm:$0x7] %v387_v1  ;;  %320 = vmatprep.subr.mxu1 %v387_v1  ;;  %315 = vmatprep.subr.mxu0 %v387_v1  ;;  %vm70_vm1 = vcmask 64512   ;;  %v67_v6 = vmul.f32 1.442695, %v48_v5  ;;  %v389_v7 = vmov 1.0   ;;  %vm290_vm3 = vcmask 1040384  }
  0x26   :  { %v51_v2 = vand.u32 127, %v50_v0  ;;  %322 = vmatprep.mubr.msk.f32.mxu1 %vm388_vm0, %v387_v1  ;;  %317 = vmatprep.mubr.msk.f32.mxu0 %vm388_vm0, %v387_v1  ;;  %vm292_vm4 = vcmask 1041408  }
  0x27   :  { %335 = vpow2.f32 %v67_v6 }
  0x28   :  { %v56_v3 = vand.u32 3, %v51_v2 }
  0x2a   :  { %vm64_vm2 = vcmp.eq.s32.totalorder %v56_v3, %v49_v4 }
  0x2b   :  { %321 = vmatpush3.msk.msra.mxu1 %vm64_vm2, %v389_v7 }
  0x2c   :  { %323 = vmatmul.mubr.msk.f32.vlgmr.msra.gmra.mrb[0].mxu1 %vm70_vm1, %v389_v7  ;;  %v294_v17 = vld [vmem:[%s443_s2] sm:$0x7] }
  0x31   :  { %v336_v8 = vpop.eup %335 }
  0x32   :  { %316 = vmatpush3.msra.mxu0 %v336_v8 }
  0x33   :  { %318 = vmatmul.mubr.msk.f32.vlgmr.msra.gmra.mrb[0].mxu0 %vm70_vm1, %v389_v7  ;;  %325 = vmatprep.subr.mxu0 %v387_v1 }
  0x34   :  { %326 = vmatpush3.msk.msra.mxu0 %vm64_vm2, %v48_v5  ;;  %327 = vmatprep.mubr.msk.f32.mxu0 %vm388_vm0, %v387_v1 }
  0x37   :  { %328 = vmatmul.mubr.msk.f32.vlgmr.msra.gmra.mrb[2].mxu0 %vm70_vm1, %v389_v7 }
  0xff   :  { %v210_v9 = vpop.f32.mrb[0].mxu1 }
 0x100   :  { %v324_v10 = vpop.f32.mrb[1].mxu1  ;;  %v285_v11 = vrot.slane %v210_v9, 7 }
 0x106   :  { %v140_v12 = vpop.f32.mrb[0].mxu0 }
 0x107   :  { %v291_v13 = vsel %vm290_vm3, %v140_v12, %v285_v11  ;;  %v319_v14 = vpop.f32.mrb[1].mxu0 }
 0x10a   :  { %v280_v15 = vpop.f32.mrb[2].mxu0 }
 0x10b   :  { %v288_v16 = vrot.slane %v280_v15, 6  ;;  %v329_v18 = vpop.f32.mrb[3].mxu0 }
 0x10d   :  { %v293_v19 = vsel %vm292_vm4, %v291_v13, %v288_v16 }
 0x10e   :  { %v295_v20 = vadd.f32 %v294_v17, %v293_v19 }
 0x110   :  { %296 = vst [vmem:[%s443_s2] sm:$0x7] %v295_v20 }
 0x111   :  { %301 = vsyncpa [#allocation3], 1 }
 0x112   :  { %302 = vsyncpa [#allocation5], 1 }

</bundles_post_ra>
